<compile_context>
chip_gen: v5e
topology: v5e:2x2
jax: 0.10.0
libtpu: 0.0.40
codegen_flags: <defaults>
</compile_context>

<pallas_src>
import math
import functools

import jax
import jax.numpy as jnp
from jax.experimental import pallas as pl
from jax.experimental.pallas import tpu as pltpu


def _round_up(x, m):
    return ((x + m - 1) // m) * m


def _gdropconnect_kernel(x_ref, w_ref, n_ref, b_ref, o_ref, acc_ref, *, matmul_dtype):
    """One (tm, tn) output tile; accumulates over the K grid axis.

    x_ref: (tm, tk)  input tile
    w_ref: (tk, tn)  pre-transposed weight tile
    n_ref: (tk, tn)  noise tile (same layout as w_ref)
    b_ref: (1,  tn)  bias tile
    o_ref: (tm, tn)  output tile
    acc_ref: (tm, tn) f32 accumulator scratch (resident across K steps)
    """
    k = pl.program_id(2)

    @pl.when(k == 0)
    def _init():
        acc_ref[...] = jnp.zeros_like(acc_ref)

    # Fuse the noise add with the matmul inputs; cast to the MXU dtype, keep
    # f32 accumulation.
    w_noisy = (w_ref[...] + n_ref[...]).astype(matmul_dtype)
    acc_ref[...] += jnp.dot(
        x_ref[...].astype(matmul_dtype),
        w_noisy,
        preferred_element_type=jnp.float32,
    )

    # Bias is added exactly once, on the final K step, then written back.
    @pl.when(k == pl.num_programs(2) - 1)
    def _finalize():
        o_ref[...] = (acc_ref[...] + b_ref[...]).astype(o_ref.dtype)


def gdropconnect_linear_add(
    x,
    weight,
    bias,
    sigma,
    noise_key,
    *,
    tm=128,
    tn=128,
    tk=512,
    matmul_dtype=jnp.bfloat16,
):
    """Forward pass of gDropconnectLinearADD.

    x:         (M, K) float32, M = batch, K = in_features
    weight:    (N, K) float32, N = out_features  (PyTorch Linear convention)
    bias:      (N,)   float32 or None
    sigma:     python float (noise std)
    noise_key: jax PRNG key for the weight noise (one realization per forward)
    """
    M, K = x.shape
    N, K2 = weight.shape
    assert K == K2, "in_features mismatch"

    x = x.astype(jnp.float32)
    weight = weight.astype(jnp.float32)
    if bias is None:
        bias = jnp.zeros((N,), dtype=jnp.float32)
    bias = bias.astype(jnp.float32)

    # Single noise realization per forward, generated directly in the (K, N)
    # RHS layout (distributionally identical to randn_like(weight).T).
    noise = sigma * jax.random.normal(noise_key, (K, N), dtype=jnp.float32)

    # Pre-transpose once in the wrapper: MXU-native (M, K) @ (K, N).
    w_t = weight.T  # (K, N)

    # Clamp tiles to the (padded) problem so tiny layers still compile, while
    # large layers get real pipelined tiling.
    tm = min(tm, _round_up(M, 8))
    tn = min(tn, _round_up(N, 128))   # lane-dense output stores
    tk = min(tk, _round_up(K, 128))

    Mp = _round_up(M, tm)
    Kp = _round_up(K, tk)
    Np = _round_up(N, tn)

    # Zero padding is exact: padded K columns of x are zero, padded N columns
    # are sliced off below.
    x_p = jnp.pad(x, ((0, Mp - M), (0, Kp - K)))
    w_p = jnp.pad(w_t, ((0, Kp - K), (0, Np - N)))
    n_p = jnp.pad(noise, ((0, Kp - K), (0, Np - N)))
    b_p = jnp.pad(bias, (0, Np - N)).reshape(1, Np)

    grid = (Mp // tm, Np // tn, Kp // tk)

    kernel = functools.partial(_gdropconnect_kernel, matmul_dtype=matmul_dtype)

    cost = pl.CostEstimate(
        flops=2 * Mp * Np * Kp,
        transcendentals=0,
        bytes_accessed=4 * (Mp * Kp + 2 * Kp * Np + Mp * Np + Np),
    )

    out = pl.pallas_call(
        kernel,
        out_shape=jax.ShapeDtypeStruct((Mp, Np), jnp.float32),
        grid_spec=pltpu.PrefetchScalarGridSpec(
            num_scalar_prefetch=0,
            grid=grid,
            in_specs=[
                pl.BlockSpec((tm, tk), lambda i, j, k: (i, k)),  # x
                pl.BlockSpec((tk, tn), lambda i, j, k: (k, j)),  # weight (K, N)
                pl.BlockSpec((tk, tn), lambda i, j, k: (k, j)),  # noise  (K, N)
                pl.BlockSpec((1, tn), lambda i, j, k: (0, j)),   # bias
            ],
            out_specs=pl.BlockSpec((tm, tn), lambda i, j, k: (i, j)),
            scratch_shapes=[pltpu.VMEM((tm, tn), jnp.float32)],
        ),
        compiler_params=pltpu.CompilerParams(
            dimension_semantics=("parallel", "parallel", "arbitrary"),
            vmem_limit_bytes=32 * 1024 * 1024,
        ),
        cost_estimate=cost,
    )(x_p, w_p, n_p, b_p)

    return out[:M, :N]


def _reference(x, weight, bias, sigma, noise_key):
    K = x.shape[1]
    N = weight.shape[0]
    noise = sigma * jax.random.normal(noise_key, (K, N), dtype=jnp.float32)
    out = x @ (weight.T + noise)
    if bias is not None:
        out = out + bias[None, :]
    return out


if __name__ == "__main__":
    # --- Test 1: module demo shapes (small, matches the PyTorch module) ------
    in_features = 32
    out_features = 16
    batch = 8
    var = 0.05
    sigma = math.sqrt(var)

    key = jax.random.PRNGKey(0)
    kx, kw, kb, kn = jax.random.split(key, 4)

    # reset_parameters(): uniform(-stdv, stdv), stdv = 1/sqrt(in_features)
    stdv = 1.0 / math.sqrt(in_features)
    weight = jax.random.uniform(kw, (out_features, in_features),
                                dtype=jnp.float32, minval=-stdv, maxval=stdv)
    bias = jax.random.uniform(kb, (out_features,),
                              dtype=jnp.float32, minval=-stdv, maxval=stdv)
    x = jax.random.normal(kx, (batch, in_features), dtype=jnp.float32)

    ref = _reference(x, weight, bias, sigma, kn)

    # f32 MXU path: tight check against the exact reference.
    out_f32 = gdropconnect_linear_add(x, weight, bias, sigma, kn,
                                      matmul_dtype=jnp.float32)
    out_f32 = jax.block_until_ready(out_f32)
    assert out_f32.shape == (batch, out_features)
    assert out_f32.dtype == jnp.float32
    assert bool(jnp.all(jnp.isfinite(out_f32)))
    max_dev_f32 = float(jnp.max(jnp.abs(out_f32 - ref)))
    assert max_dev_f32 < 1e-4, f"f32 path deviation {max_dev_f32}"

    # Default bf16 MXU path: loose check (bf16 rounding << injected noise).
    out_bf16 = gdropconnect_linear_add(x, weight, bias, sigma, kn)
    out_bf16 = jax.block_until_ready(out_bf16)
    assert out_bf16.shape == (batch, out_features)
    assert bool(jnp.all(jnp.isfinite(out_bf16)))
    tol1 = 5e-2 * (1.0 + float(jnp.max(jnp.abs(ref))))
    max_dev_bf16 = float(jnp.max(jnp.abs(out_bf16 - ref)))
    assert max_dev_bf16 < tol1, f"bf16 path deviation {max_dev_bf16} > {tol1}"

    # --- Test 2: larger shapes exercising the full (M, N, K) tiled grid ------
    M2, K2, N2 = 256, 640, 320   # pads to (256, 1024, 384): grid (2, 3, 2)
    key2 = jax.random.PRNGKey(1)
    k2x, k2w, k2b, k2n = jax.random.split(key2, 4)
    stdv2 = 1.0 / math.sqrt(K2)
    w2 = jax.random.uniform(k2w, (N2, K2), dtype=jnp.float32,
                            minval=-stdv2, maxval=stdv2)
    b2 = jax.random.uniform(k2b, (N2,), dtype=jnp.float32,
                            minval=-stdv2, maxval=stdv2)
    x2 = jax.random.normal(k2x, (M2, K2), dtype=jnp.float32)

    ref2 = _reference(x2, w2, b2, sigma, k2n)
    out2 = gdropconnect_linear_add(x2, w2, b2, sigma, k2n)
    out2 = jax.block_until_ready(out2)
    assert out2.shape == (M2, N2)
    assert bool(jnp.all(jnp.isfinite(out2)))
    tol2 = 5e-2 * (1.0 + float(jnp.max(jnp.abs(ref2))))
    max_dev2 = float(jnp.max(jnp.abs(out2 - ref2)))
    assert max_dev2 < tol2, f"tiled bf16 deviation {max_dev2} > {tol2}"

    print("KERNEL_OK")
</pallas_src>

<mosaic_0001>
module attributes {stable_mosaic.version = 11 : i64} {
  func.func @_gdropconnect_kernel(%arg0: i32, %arg1: i32, %arg2: i32, %arg3: memref<8x128xf32, #tpu.memory_space<vmem>>, %arg4: memref<128x128xf32, #tpu.memory_space<vmem>>, %arg5: memref<128x128xf32, #tpu.memory_space<vmem>>, %arg6: memref<1x128xf32, #tpu.memory_space<vmem>>, %arg7: memref<8x128xf32, #tpu.memory_space<vmem>>, %arg8: memref<8x128xf32, #tpu.memory_space<vmem>>) attributes {dimension_semantics = [#tpu.dimension_semantics<parallel>, #tpu.dimension_semantics<parallel>, #tpu.dimension_semantics<arbitrary>], iteration_bounds = array<i64: 1, 1, 1>, scalar_prefetch = 0 : i64, scratch_operands = 1 : i64, tpu.core_type = #tpu.core_type<tc>, window_params = [{transform_indices = @transform_0, window_bounds = array<i64: 8, 128>}, {transform_indices = @transform_1, window_bounds = array<i64: 128, 128>}, {transform_indices = @transform_2, window_bounds = array<i64: 128, 128>}, {transform_indices = @transform_3, window_bounds = array<i64: 1, 128>}, {transform_indices = @transform_4, window_bounds = array<i64: 8, 128>}]} {
    %c0_i32 = arith.constant 0 : i32
    %0 = arith.cmpi eq, %arg2, %c0_i32 : i32
    %1 = arith.extui %0 : i1 to i32
    %c0_i32_0 = arith.constant 0 : i32
    %2 = arith.cmpi ne, %1, %c0_i32_0 : i32
    scf.if %2 {
      %cst_12 = arith.constant 0.000000e+00 : f32
      %14 = vector.broadcast %cst_12 : f32 to vector<8x128xf32>
      %c0_13 = arith.constant 0 : index
      %c0_14 = arith.constant 0 : index
      %15 = vector.load %arg8[%c0_13, %c0_14] : memref<8x128xf32, #tpu.memory_space<vmem>>, vector<8x128xf32>
      tpu.vector_store %arg8[%c0_13, %c0_14], %14 {strides = array<i32>} : memref<8x128xf32, #tpu.memory_space<vmem>>, vector<8x128xf32>,
    } else {
    }
    %c0 = arith.constant 0 : index
    %c0_1 = arith.constant 0 : index
    %3 = vector.load %arg4[%c0, %c0_1] : memref<128x128xf32, #tpu.memory_space<vmem>>, vector<128x128xf32>
    %c0_2 = arith.constant 0 : index
    %c0_3 = arith.constant 0 : index
    %4 = vector.load %arg5[%c0_2, %c0_3] : memref<128x128xf32, #tpu.memory_space<vmem>>, vector<128x128xf32>
    %5 = arith.addf %3, %4 : vector<128x128xf32>
    %c0_4 = arith.constant 0 : index
    %c0_5 = arith.constant 0 : index
    %6 = vector.load %arg8[%c0_4, %c0_5] : memref<8x128xf32, #tpu.memory_space<vmem>>, vector<8x128xf32>
    %c0_6 = arith.constant 0 : index
    %c0_7 = arith.constant 0 : index
    %7 = vector.load %arg3[%c0_6, %c0_7] : memref<8x128xf32, #tpu.memory_space<vmem>>, vector<8x128xf32>
    %cst = arith.constant dense<0.000000e+00> : vector<8x128xf32>
    %8 = tpu.matmul %7, %5, %cst {dimension_numbers = #tpu.dot_dimension_numbers<[1], [0], [0], [1], [0, 0, 1, 1], [], []>} : vector<8x128xf32>, vector<128x128xf32>, vector<8x128xf32> -> vector<8x128xf32>
    %9 = arith.addf %6, %8 : vector<8x128xf32>
    %c0_8 = arith.constant 0 : index
    %c0_9 = arith.constant 0 : index
    %10 = vector.load %arg8[%c0_8, %c0_9] : memref<8x128xf32, #tpu.memory_space<vmem>>, vector<8x128xf32>
    tpu.vector_store %arg8[%c0_8, %c0_9], %9 {strides = array<i32>} : memref<8x128xf32, #tpu.memory_space<vmem>>, vector<8x128xf32>,
    %c0_i32_10 = arith.constant 0 : i32
    %11 = arith.cmpi eq, %arg2, %c0_i32_10 : i32
    %12 = arith.extui %11 : i1 to i32
    %c0_i32_11 = arith.constant 0 : i32
    %13 = arith.cmpi ne, %12, %c0_i32_11 : i32
    scf.if %13 {
      %c0_12 = arith.constant 0 : index
      %c0_13 = arith.constant 0 : index
      %14 = vector.load %arg8[%c0_12, %c0_13] : memref<8x128xf32, #tpu.memory_space<vmem>>, vector<8x128xf32>
      %c0_14 = arith.constant 0 : index
      %c0_15 = arith.constant 0 : index
      %15 = vector.load %arg6[%c0_14, %c0_15] : memref<1x128xf32, #tpu.memory_space<vmem>>, vector<1x128xf32>
      %16 = vector.broadcast %15 : vector<1x128xf32> to vector<8x128xf32>
      %17 = arith.addf %14, %16 : vector<8x128xf32>
      %c0_16 = arith.constant 0 : index
      %c0_17 = arith.constant 0 : index
      %18 = vector.load %arg7[%c0_16, %c0_17] : memref<8x128xf32, #tpu.memory_space<vmem>>, vector<8x128xf32>
      tpu.vector_store %arg7[%c0_16, %c0_17], %17 {strides = array<i32>} : memref<8x128xf32, #tpu.memory_space<vmem>>, vector<8x128xf32>,
    } else {
    }
    return
  }
  func.func @transform_0(%arg0: i32, %arg1: i32, %arg2: i32) -> (i32, i32) {
    %c0_i32 = arith.constant 0 : i32
    return %arg0, %arg2 : i32, i32
  }
  func.func @transform_1(%arg0: i32, %arg1: i32, %arg2: i32) -> (i32, i32) {
    %c0_i32 = arith.constant 0 : i32
    return %arg2, %arg1 : i32, i32
  }
  func.func @transform_2(%arg0: i32, %arg1: i32, %arg2: i32) -> (i32, i32) {
    %c0_i32 = arith.constant 0 : i32
    return %arg2, %arg1 : i32, i32
  }
  func.func @transform_3(%arg0: i32, %arg1: i32, %arg2: i32) -> (i32, i32) {
    %c0_i32 = arith.constant 0 : i32
    %c0_i32_0 = arith.constant 0 : i32
    return %c0_i32, %arg1 : i32, i32
  }
  func.func @transform_4(%arg0: i32, %arg1: i32, %arg2: i32) -> (i32, i32) {
    %c0_i32 = arith.constant 0 : i32
    return %arg0, %arg1 : i32, i32
  }
}

</mosaic_0001>

<bundles_post_ra>
// kernel: tpu_custom_call.1
= control target key start
LH: loop header
LB: loop body
LE: loop exit
PB: predicated region body
PF: predicated region fallthrough
CT: control target
= control target key end

     0   :  { %9 = vsyncpa [#allocation4], 0  ;;  %s323_s0 = inlined_call_operand.hbm [shape: f32[8,128], index: 0, kind: input, shape index: {}]   ;;  %s324_s1 = inlined_call_operand.hbm [shape: f32[128,128], index: 1, kind: input, shape index: {}]   ;;  %s325_s2 = inlined_call_operand.hbm [shape: f32[128,128], index: 2, kind: input, shape index: {}]   ;;  %s326_s3 = inlined_call_operand.vmem [shape: f32[1,128], index: 3, kind: input, shape index: {}]   ;;  %s327_s4 = inlined_call_operand.hbm [shape: f32[8,128], index: 4, kind: output, shape index: {}]  }
   0x1   :  { %10 = vsyncpa [#allocation7], 0  ;;  %s27_s17 = sshll.u32 %s324_s1, 4  ;;  %s28_s17 = int_to_ptr.hbm [resolvable:$true] %s27_s17 }
   0x2   :  { %11 = vsyncpa [#allocation5], 0  ;;  %s277_s18 = smov [#allocation6]   ;;  %s17_s22 = sshll.u32 %s323_s0, 4  ;;  %s18_s22 = int_to_ptr.hbm [resolvable:$true] %s17_s22 }
   0x3   :  { %s29_s19 = sshll.u32 %s277_s18, 4  ;;  %s278_s23 = smov 128   ;;  %s30_s19 = int_to_ptr.vmem [resolvable:$true] %s29_s19 }
   0x4   :  { %s279_s24 = smov 8   ;;  %s280_s25 = smov [#allocation3]  }
   0x5   :  { %35 = dma.hbm_to_vmem [thread:$0]  %s28_s17, 2048, %s30_s19, [#allocation7], %s278_s23, %s278_s23, %s279_s24  }
   0x6   :  { %s19_s26 = sshll.u32 %s280_s25, 4  ;;  %s40_s29 = sshll.u32 %s325_s2, 4  ;;  %s20_s26 = int_to_ptr.vmem [resolvable:$true] %s19_s26  ;;  %s41_s29 = int_to_ptr.hbm [resolvable:$true] %s40_s29 }
   0x7   :  { %22 = dma.hbm_to_vmem [thread:$0]  %s18_s22, 128, %s20_s26, [#allocation4]  }
   0x8   :  { %s281_s1 = smov [#allocation8]  }
   0x9   :  { %s42_s30 = sshll.u32 %s281_s1, 4  ;;  %s43_s30 = int_to_ptr.vmem [resolvable:$true] %s42_s30 }
   0xa   :  { %48 = dma.hbm_to_vmem [thread:$0]  %s41_s29, 2048, %s43_s30, [#allocation7], %s278_s23, %s278_s23, %s279_s24  }
   0xb   :  { %271 = dma.done.wait [#allocation4], 128  }
   0xc   :  { %272 = vsyncadd [#allocation4], 4294967168 }
   0xd   :  { %273 = dma.done.wait [#allocation7], 4096  }
   0xe   :  { %274 = vsyncadd [#allocation7], 4294963200  ;;  %v83_v0 = vld [vmem:[#allocation6 + $0x78] sm:$0xff]  ;;  %v82_v2 = vld [vmem:[#allocation6 + $0x70] sm:$0xff]  ;;  %s282_s5 = smov [#allocation9]   ;;  %s157_s9 = sshll.u32 %s327_s4, 4  ;;  %s158_s9 = int_to_ptr.hbm [resolvable:$true] %s157_s9 }
   0xf   :  { %v99_v1 = vld [vmem:[#allocation8 + $0x78] sm:$0xff]  ;;  %v98_v4 = vld [vmem:[#allocation8 + $0x70] sm:$0xff]  ;;  %v81_v5 = vld [vmem:[#allocation6 + $0x68] sm:$0xff]  ;;  %s155_s6 = sshll.u32 %s282_s5, 4  ;;  %s156_s6 = int_to_ptr.vmem [resolvable:$true] %s155_s6 }
  0x10   :  { %v115_v3 = vadd.f32 %v99_v1, %v83_v0  ;;  %v97_v6 = vld [vmem:[#allocation8 + $0x68] sm:$0xff]  ;;  %v114_v7 = vadd.f32 %v98_v4, %v82_v2  ;;  %v80_v8 = vld [vmem:[#allocation6 + $0x60] sm:$0xff]  ;;  %v79_v11 = vld [vmem:[#allocation6 + $0x58] sm:$0xff] }
  0x11   :  { %v96_v9 = vld [vmem:[#allocation8 + $0x60] sm:$0xff]  ;;  %v113_v10 = vadd.f32 %v97_v6, %v81_v5  ;;  %v95_v12 = vld [vmem:[#allocation8 + $0x58] sm:$0xff]  ;;  %v78_v14 = vld [vmem:[#allocation6 + $0x50] sm:$0xff] }
  0x12   :  { %118 = vmatpush.msra.mxu0 %v115_v3  ;;  %v112_v13 = vadd.f32 %v96_v9, %v80_v8  ;;  %v94_v15 = vld [vmem:[#allocation8 + $0x50] sm:$0xff]  ;;  %v111_v16 = vadd.f32 %v95_v12, %v79_v11  ;;  %v77_v17 = vld [vmem:[#allocation6 + $0x48] sm:$0xff]  ;;  %v76_v20 = vld [vmem:[#allocation6 + $0x40] sm:$0xff] }
  0x13   :  { %v93_v18 = vld [vmem:[#allocation8 + $0x48] sm:$0xff]  ;;  %v110_v19 = vadd.f32 %v94_v15, %v78_v14  ;;  %v92_v21 = vld [vmem:[#allocation8 + $0x40] sm:$0xff]  ;;  %v75_v23 = vld [vmem:[#allocation6 + $0x38] sm:$0xff] }
  0x14   :  { %119 = vmatpush.msra.mxu0 %v114_v7  ;;  %v109_v22 = vadd.f32 %v93_v18, %v77_v17  ;;  %v91_v24 = vld [vmem:[#allocation8 + $0x38] sm:$0xff]  ;;  %v108_v25 = vadd.f32 %v92_v21, %v76_v20  ;;  %v74_v26 = vld [vmem:[#allocation6 + $0x30] sm:$0xff]  ;;  %v73_v29 = vld [vmem:[#allocation6 + $0x28] sm:$0xff] }
  0x15   :  { %v90_v27 = vld [vmem:[#allocation8 + $0x30] sm:$0xff]  ;;  %v107_v28 = vadd.f32 %v91_v24, %v75_v23  ;;  %v89_v30 = vld [vmem:[#allocation8 + $0x28] sm:$0xff]  ;;  %v72_v32 = vld [vmem:[#allocation6 + $0x20] sm:$0xff] }
  0x16   :  { %120 = vmatpush.msra.mxu0 %v113_v10  ;;  %v106_v31 = vadd.f32 %v90_v27, %v74_v26  ;;  %v88_v33 = vld [vmem:[#allocation8 + $0x20] sm:$0xff]  ;;  %v105_v34 = vadd.f32 %v89_v30, %v73_v29  ;;  %v71_v35 = vld [vmem:[#allocation6 + $0x18] sm:$0xff]  ;;  %v70_v38 = vld [vmem:[#allocation6 + $0x10] sm:$0xff] }
  0x17   :  { %v87_v36 = vld [vmem:[#allocation8 + $0x18] sm:$0xff]  ;;  %v104_v37 = vadd.f32 %v88_v33, %v72_v32  ;;  %v86_v39 = vld [vmem:[#allocation8 + $0x10] sm:$0xff]  ;;  %v69_v41 = vld [vmem:[#allocation6 + $0x8] sm:$0xff] }
  0x18   :  { %121 = vmatpush.msra.mxu0 %v112_v13  ;;  %v103_v40 = vadd.f32 %v87_v36, %v71_v35  ;;  %v85_v42 = vld [vmem:[#allocation8 + $0x8] sm:$0xff]  ;;  %v102_v43 = vadd.f32 %v86_v39, %v70_v38  ;;  %v68_v44 = vld [vmem:[#allocation6] sm:$0xff]  ;;  %v117_v48 = vld [vmem:[#allocation3] sm:$0xff] }
  0x19   :  { %v84_v45 = vld [vmem:[#allocation8] sm:$0xff]  ;;  %v101_v46 = vadd.f32 %v85_v42, %v69_v41  ;;  %v174_v49 = vld [vmem:[%s326_s3] ss:$0 sm:$0xff] }
  0x1a   :  { %122 = vmatpush.msra.mxu0 %v111_v16  ;;  %v100_v47 = vadd.f32 %v84_v45, %v68_v44 }
  0x1c   :  { %123 = vmatpush.msra.mxu0 %v110_v19 }
  0x1e   :  { %124 = vmatpush.msra.mxu0 %v109_v22 }
  0x20   :  { %125 = vmatpush.msra.mxu0 %v108_v25 }
  0x22   :  { %126 = vmatpush.msra.mxu0 %v107_v28 }
  0x24   :  { %127 = vmatpush.msra.mxu0 %v106_v31 }
  0x26   :  { %128 = vmatpush.msra.mxu0 %v105_v34 }
  0x28   :  { %129 = vmatpush.msra.mxu0 %v104_v37 }
  0x2a   :  { %130 = vmatpush.msra.mxu0 %v103_v40 }
  0x2c   :  { %131 = vmatpush.msra.mxu0 %v102_v43 }
  0x2e   :  { %132 = vmatpush.msra.mxu0 %v101_v46 }
  0x30   :  { %133 = vmatpush.msra.mxu0 %v100_v47 }
  0x31   :  { %134 = vmatmul.f32.vlgmr.msra.gmra.mxu0 %v117_v48 }
  0xae   :  { %v135_v50 = vpop.f32.mrf.mxu0 }
  0xaf   :  { %v148_v51 = vadd.f32 %v174_v49, %v135_v50 }
  0xb1   :  { %149 = vst [vmem:[#allocation9] sm:$0xff] %v148_v51 }
  0xb2   :  { %160 = dma.vmem_to_hbm [thread:$0]  %s156_s6, 128, %s158_s9, [#allocation5]  }
  0xb3   :  { %275 = dma.done.wait [#allocation5], 128  }
  0xb4   :  { %276 = vsyncadd [#allocation5], 4294967168 }
  0xb5   :  { %165 = vsyncpa [#allocation4], 1 }
  0xb6   :  { %166 = vsyncpa [#allocation7], 1 }
  0xb7   :  { %167 = vsyncpa [#allocation5], 1 }

</bundles_post_ra>
